<compile_context>
chip_gen: v5e
topology: v5e:2x2
jax: 0.10.0
libtpu: 0.0.40
codegen_flags: <defaults>
</compile_context>

<pallas_src>
import math
import numpy as np
import jax
import jax.numpy as jnp
from jax import lax
from jax.experimental import pallas as pl
from jax.experimental.pallas import tpu as pltpu

# ---------------- config (mirrors VC.__init__ arguments) ----------------
MODEL_NAME = "mainvc"
SAMPLE_RATE = 16000
MEL = dict(n_fft=[64], win_length=[64], hop_length=[16], n_mels=[16],
           f_min=0.0, f_max=8000.0, shuffle_size=4, preemph=0.97)
REG = dict(rec=10.0, kl=1.0, sia=1.0, mi=0.0)
HIDDEN = 32      # synthetic core latent dim
SPK_DIM = 32     # synthetic speaker-embedding dim
EPS_LOG = 1e-9

N_FFT = MEL['n_fft'][0]
WIN_L = MEL['win_length'][0]
HOP = MEL['hop_length'][0]
N_MELS = MEL['n_mels'][0]
N_FREQ = N_FFT // 2 + 1

LANE = 128         # TPU lane width (packed output width)
HALF = LANE // 2   # im part of the folded DFT lives in lanes [HALF, HALF+N_FREQ)
POOL_OFF = 8       # reference-batch pooled rows start at sublane 8 (aligned slice)
LOSS_LANE = 2 * N_MELS   # lane of row 0 that carries the scalar loss


def _vmem():
    return pl.BlockSpec(memory_space=pltpu.MemorySpace.VMEM)


# ---------------- host-side constants ----------------
def _hz_to_mel(f):  # HTK (torchaudio default mel_scale='htk')
    return 2595.0 * np.log10(1.0 + f / 700.0)


def _mel_to_hz(m):
    return 700.0 * (10.0 ** (m / 2595.0) - 1.0)


def mel_filterbank(n_freq, n_mels):
    all_freqs = np.linspace(0.0, SAMPLE_RATE / 2.0, n_freq)
    m_pts = np.linspace(_hz_to_mel(MEL['f_min']), _hz_to_mel(MEL['f_max']), n_mels + 2)
    f_pts = _mel_to_hz(m_pts)
    f_diff = f_pts[1:] - f_pts[:-1]
    slopes = f_pts[None, :] - all_freqs[:, None]
    down = -slopes[:, :-2] / f_diff[:-1]
    up = slopes[:, 2:] / f_diff[1:]
    return np.maximum(0.0, np.minimum(down, up))  # (n_freq, n_mels), HTK, norm=None


def _dft_matrix_folded():
    """(n_fft, 128): windowed cos in lanes [0,N_FREQ), -win*sin in [HALF, HALF+N_FREQ).

    N=128 instead of 256: on v5e this halves the MXU passes of the dominant
    matmul; |X| is later recovered with a free XLU half-rotation."""
    n = np.arange(N_FFT)
    # periodic hann; valid fold since win_length == n_fft (torchaudio would
    # center-pad the window otherwise).
    win = 0.5 * (1.0 - np.cos(2.0 * np.pi * n / WIN_L))
    k = np.arange(N_FREQ)
    ang = 2.0 * np.pi * np.outer(n, k) / N_FFT
    dft = np.zeros((N_FFT, LANE), np.float32)
    dft[:, :N_FREQ] = win[:, None] * np.cos(ang)
    dft[:, HALF:HALF + N_FREQ] = -(win[:, None] * np.sin(ang))
    return dft


def _fb_padded():
    """(128, n_mels): mel filterbank zero-padded in K so no slicing of |X| is needed
    (the zero rows also kill the folded-DFT garbage lanes)."""
    fb = np.zeros((LANE, N_MELS), np.float32)
    fb[:N_FREQ] = mel_filterbank(N_FREQ, N_MELS)
    return fb


def _pool_matrix(B, T):
    """(POOL_OFF+B, 2*B*T) time-mean pooling matrix over the stacked [audio; ref] rows."""
    assert B <= POOL_OFF
    pool = np.zeros((POOL_OFF + B, 2 * B * T), np.float32)
    for b in range(B):
        pool[b, b * T:(b + 1) * T] = 1.0 / T                          # source batches
        pool[POOL_OFF + b, (B + b) * T:(B + b + 1) * T] = 1.0 / T     # reference batches
    return pool


# ---------------- host glue: pre-emphasis + gather-free framing ----------------
def _preemphasis(audio):
    # lfilter(a=[1,0], b=[1,-p]) -> y[n] = x[n] - p*x[n-1]
    p = MEL['preemph']
    if p > 0:
        prev = jnp.concatenate([jnp.zeros_like(audio[:, :1]), audio[:, :-1]], axis=1)
        audio = audio - p * prev
    return audio


def _frame(audio):
    """(NB, L) -> ((NB*T, n_fft) bf16 frames, T). center=True reflect pad; no gather."""
    pad = N_FFT // 2
    x = jnp.pad(audio, ((0, 0), (pad, pad)), mode='reflect')   # (NB, L + n_fft) f32
    x = x.astype(jnp.bfloat16)                                  # cast once; fuses with the concat
    NB, Lp = x.shape
    assert Lp % HOP == 0 and N_FFT % HOP == 0
    T = 1 + audio.shape[1] // HOP
    chunks = x.reshape(NB, Lp // HOP, HOP)
    # frame t = hop-chunks [t, t+1, ..., t + n_fft//hop - 1] concatenated
    frames = jnp.concatenate(
        [chunks[:, j:j + T, :] for j in range(N_FFT // HOP)], axis=-1)  # (NB, T, n_fft)
    return frames.reshape(NB * T, N_FFT), T


# ---------------- the single fused kernel ----------------
def vc_fused_kernel(frames_ref, dft_ref, fb_ref, pool_ref,
                    w_enc_ref, w_mu_ls_ref, w_dec_ref, w_spk_ref,
                    packed_ref):
    BT = packed_ref.shape[0]                       # frame rows belonging to the source audio

    # ---- log-mel for [audio ; ref_audio] in one MXU pass ----
    reim = jnp.dot(frames_ref[...], dft_ref[...],
                   preferred_element_type=jnp.float32)            # (2*B*T, 128) f32
    sq = reim * reim
    # |X| = sqrt(re^2 + im^2): fold the im half (lanes [64,97)) onto the re half
    # (lanes [0,33)) with a free XLU half-rotation (shift 64 == -64 mod 128).
    # Lanes >= N_FREQ carry garbage that the filterbank's zero rows annihilate.
    mag = jnp.sqrt(sq + pltpu.roll(sq, shift=HALF, axis=1)).astype(jnp.bfloat16)
    mel = jnp.dot(mag, fb_ref[...],
                  preferred_element_type=jnp.float32)             # (2*B*T, n_mels)
    logmel = jnp.log(mel + EPS_LOG)                               # (mel + 1e-9).log()
    lm_x = logmel[:BT]                                            # source log-mel (target)

    # ---- synthetic core: flat 2-D bf16 matmuls, f32 accumulation ----
    h = jnp.tanh(jnp.dot(lm_x.astype(jnp.bfloat16), w_enc_ref[...],
                         preferred_element_type=jnp.float32))     # (BT, H)
    mu_ls = jnp.dot(h.astype(jnp.bfloat16), w_mu_ls_ref[...],
                    preferred_element_type=jnp.float32)           # (BT, 2H) = [mu | log_sigma]
    # dec = mu @ w_dec; w_dec_ref is (2H, M) with a zero bottom half so mu_ls
    # never has to be sliced.
    dec = jnp.dot(mu_ls.astype(jnp.bfloat16), w_dec_ref[...],
                  preferred_element_type=jnp.float32)             # (BT, M)

    # speaker embeddings: mean over time via a pooling matmul, then project.
    # (time_shuffle is a permutation of time -> identical after the time-mean)
    means = jnp.dot(pool_ref[...], logmel.astype(jnp.bfloat16),
                    preferred_element_type=jnp.float32)           # (POOL_OFF+B, n_mels)
    spk = jnp.dot(means.astype(jnp.bfloat16), w_spk_ref[...],
                  preferred_element_type=jnp.float32)             # (POOL_OFF+B, SPK_DIM)
    B = spk.shape[0] - POOL_OFF
    emb_ = spk[:B]                                                # from (shuffled) source mel
    emb = spk[POOL_OFF:]                                          # from reference mel

    # ---- losses ----
    loss_rec = jnp.mean(jnp.abs(dec - lm_x))                      # F.l1_loss (mean)

    # KL on the fused [mu | log_sigma] block via a column mask (no slicing):
    # 0.5 * mean(exp(ls) + mu^2 - 1 - ls) over the BT*HIDDEN latent elements.
    col = lax.broadcasted_iota(jnp.int32, mu_ls.shape, 1)
    kl_elem = jnp.where(col < HIDDEN,
                        mu_ls * mu_ls,                            # mu**2
                        jnp.exp(mu_ls) - 1.0 - mu_ls)             # exp(ls) - 1 - ls
    loss_kl = 0.5 * jnp.sum(kl_elem) / (BT * HIDDEN)

    # cosine-embedding loss (target=+1), per-norm clamp like F.cosine_similarity
    num = jnp.sum(emb * emb_, axis=-1, keepdims=True)             # (B, 1)
    n1 = jnp.maximum(jnp.sqrt(jnp.sum(emb * emb, axis=-1, keepdims=True)), 1e-8)
    n2 = jnp.maximum(jnp.sqrt(jnp.sum(emb_ * emb_, axis=-1, keepdims=True)), 1e-8)
    loss_sia = jnp.mean(1.0 - num / (n1 * n2))

    total = REG['rec'] * loss_rec + REG['kl'] * loss_kl + REG['sia'] * loss_sia
    # REG['mi'] == 0 -> MI branch skipped, matching the reference forward.

    # ---- single lane-dense packed output ----
    # lanes [0,16): logmel   lanes [16,32): dec   lane 32 of row 0: total loss
    prow = lax.broadcasted_iota(jnp.int32, (BT, LANE - 2 * N_MELS), 0)
    pcol = lax.broadcasted_iota(jnp.int32, (BT, LANE - 2 * N_MELS), 1)
    pad = jnp.where((prow == 0) & (pcol == 0), total, 0.0)
    packed_ref[...] = jnp.concatenate([lm_x, dec, pad], axis=-1)


# ---------------- one-time prepare (hoisted out of the per-step forward) ----------------
def prepare(params, B, L):
    """Fused/padded bf16 weights + DFT / filterbank / pooling constants, built once."""
    T = 1 + L // HOP
    return dict(
        dft=jnp.asarray(_dft_matrix_folded(), jnp.bfloat16),       # (n_fft, 128)
        fb=jnp.asarray(_fb_padded(), jnp.bfloat16),                # (128, n_mels)
        pool=jnp.asarray(_pool_matrix(B, T), jnp.bfloat16),        # (POOL_OFF+B, 2*B*T)
        w_enc=params['w_enc'].astype(jnp.bfloat16),                # (M, H)
        w_mu_ls=jnp.concatenate([params['w_mu'], params['w_ls']],
                                axis=1).astype(jnp.bfloat16),      # (H, 2H)
        w_dec=jnp.concatenate([params['w_dec'],
                               jnp.zeros_like(params['w_dec'])],
                              axis=0).astype(jnp.bfloat16),        # (2H, M), bottom half 0
        w_spk=params['w_spk'].astype(jnp.bfloat16),                # (M, SPK)
    )


# ---------------- full forward ----------------
@jax.jit
def vc_forward(audio, ref_audio, prep):
    assert MODEL_NAME == "mainvc"
    B, _ = audio.shape

    both = _preemphasis(jnp.concatenate([audio, ref_audio], axis=0))   # (2B, L)
    frames2d, T = _frame(both)                                         # (2B*T, n_fft) bf16

    packed = pl.pallas_call(
        vc_fused_kernel,
        out_shape=jax.ShapeDtypeStruct((B * T, LANE), jnp.float32),    # [logmel | dec | loss,0...]
        in_specs=[_vmem()] * 8,
        out_specs=_vmem(),
    )(frames2d, prep['dft'], prep['fb'], prep['pool'],
      prep['w_enc'], prep['w_mu_ls'], prep['w_dec'], prep['w_spk'])

    logmel_x = packed[:, :N_MELS]
    dec = packed[:, N_MELS:2 * N_MELS]
    loss = packed[0, LOSS_LANE]

    # back to PyTorch NCT layout (B, n_mels, T) for pred / target
    pred = jnp.transpose(dec.reshape(B, T, N_MELS), (0, 2, 1))
    target = jnp.transpose(logmel_x.reshape(B, T, N_MELS), (0, 2, 1))
    return {'pred': pred, 'loss': loss}, target


def init_params(key):
    M = N_MELS
    k1, k2, k3, k4, k5 = jax.random.split(key, 5)

    def lin(k, fan_in, fan_out):
        return jax.random.normal(k, (fan_in, fan_out), jnp.float32) / math.sqrt(fan_in)

    return dict(w_enc=lin(k1, M, HIDDEN),
                w_mu=lin(k2, HIDDEN, HIDDEN),
                w_ls=lin(k3, HIDDEN, HIDDEN),
                w_dec=lin(k4, HIDDEN, M),
                w_spk=lin(k5, M, SPK_DIM))


if __name__ == "__main__":
    key = jax.random.PRNGKey(0)
    ka, kr, kp = jax.random.split(key, 3)
    B, L = 2, 256
    audio = 0.1 * jax.random.normal(ka, (B, L), jnp.float32)
    ref_audio = 0.1 * jax.random.normal(kr, (B, L), jnp.float32)
    params = init_params(kp)
    prep = prepare(params, B, L)          # weight fusion + constants hoisted, built once

    output, target = vc_forward(audio, ref_audio, prep)
    jax.block_until_ready((output['pred'], output['loss'], target))
    T = 1 + L // HOP
    assert output['pred'].shape == (B, N_MELS, T)
    assert target.shape == (B, N_MELS, T)
    assert output['loss'].shape == ()
    print("KERNEL_OK")
</pallas_src>

<mosaic_0001>
module attributes {stable_mosaic.version = 11 : i64} {
  func.func @vc_fused_kernel(%arg0: memref<68x64xbf16, #tpu.memory_space<vmem>>, %arg1: memref<64x128xbf16, #tpu.memory_space<vmem>>, %arg2: memref<128x16xbf16, #tpu.memory_space<vmem>>, %arg3: memref<10x68xbf16, #tpu.memory_space<vmem>>, %arg4: memref<16x32xbf16, #tpu.memory_space<vmem>>, %arg5: memref<32x64xbf16, #tpu.memory_space<vmem>>, %arg6: memref<64x16xbf16, #tpu.memory_space<vmem>>, %arg7: memref<16x32xbf16, #tpu.memory_space<vmem>>, %arg8: memref<34x128xf32, #tpu.memory_space<vmem>>) attributes {dimension_semantics = [], scalar_prefetch = 0 : i64, scratch_operands = 0 : i64, tpu.core_type = #tpu.core_type<tc>} {
    %c0 = arith.constant 0 : index
    %c0_0 = arith.constant 0 : index
    %0 = vector.load %arg0[%c0, %c0_0] : memref<68x64xbf16, #tpu.memory_space<vmem>>, vector<68x64xbf16>
    %c0_1 = arith.constant 0 : index
    %c0_2 = arith.constant 0 : index
    %1 = vector.load %arg1[%c0_1, %c0_2] : memref<64x128xbf16, #tpu.memory_space<vmem>>, vector<64x128xbf16>
    %cst = arith.constant dense<0.000000e+00> : vector<68x128xf32>
    %2 = tpu.matmul %0, %1, %cst {dimension_numbers = #tpu.dot_dimension_numbers<[1], [0], [0], [1], [0, 0, 1, 1], [], []>} : vector<68x64xbf16>, vector<64x128xbf16>, vector<68x128xf32> -> vector<68x128xf32>
    %3 = arith.mulf %2, %2 : vector<68x128xf32>
    %c64_i32 = arith.constant 64 : i32
    %4 = tpu.dynamic_rotate %3 by %c64_i32 dim 1 : vector<68x128xf32>, i32 -> vector<68x128xf32>
    %5 = arith.addf %3, %4 : vector<68x128xf32>
    %6 = math.sqrt %5 : vector<68x128xf32>
    %7 = arith.truncf %6 : vector<68x128xf32> to vector<68x128xbf16>
    %c0_3 = arith.constant 0 : index
    %c0_4 = arith.constant 0 : index
    %8 = vector.load %arg2[%c0_3, %c0_4] : memref<128x16xbf16, #tpu.memory_space<vmem>>, vector<128x16xbf16>
    %cst_5 = arith.constant dense<0.000000e+00> : vector<68x16xf32>
    %9 = tpu.matmul %7, %8, %cst_5 {dimension_numbers = #tpu.dot_dimension_numbers<[1], [0], [0], [1], [0, 0, 1, 1], [], []>} : vector<68x128xbf16>, vector<128x16xbf16>, vector<68x16xf32> -> vector<68x16xf32>
    %cst_6 = arith.constant 9.99999971E-10 : f32
    %10 = vector.broadcast %cst_6 : f32 to vector<68x16xf32>
    %11 = arith.addf %9, %10 : vector<68x16xf32>
    %12 = math.log %11 : vector<68x16xf32>
    %13 = vector.extract_strided_slice %12 {offsets = [0, 0], sizes = [34, 16], strides = [1, 1]} : vector<68x16xf32> to vector<34x16xf32>
    %14 = arith.truncf %13 : vector<34x16xf32> to vector<34x16xbf16>
    %c0_7 = arith.constant 0 : index
    %c0_8 = arith.constant 0 : index
    %15 = vector.load %arg4[%c0_7, %c0_8] : memref<16x32xbf16, #tpu.memory_space<vmem>>, vector<16x32xbf16>
    %cst_9 = arith.constant dense<0.000000e+00> : vector<34x32xf32>
    %16 = tpu.matmul %14, %15, %cst_9 {dimension_numbers = #tpu.dot_dimension_numbers<[1], [0], [0], [1], [0, 0, 1, 1], [], []>} : vector<34x16xbf16>, vector<16x32xbf16>, vector<34x32xf32> -> vector<34x32xf32>
    %17 = math.tanh %16 : vector<34x32xf32>
    %18 = arith.truncf %17 : vector<34x32xf32> to vector<34x32xbf16>
    %c0_10 = arith.constant 0 : index
    %c0_11 = arith.constant 0 : index
    %19 = vector.load %arg5[%c0_10, %c0_11] : memref<32x64xbf16, #tpu.memory_space<vmem>>, vector<32x64xbf16>
    %cst_12 = arith.constant dense<0.000000e+00> : vector<34x64xf32>
    %20 = tpu.matmul %18, %19, %cst_12 {dimension_numbers = #tpu.dot_dimension_numbers<[1], [0], [0], [1], [0, 0, 1, 1], [], []>} : vector<34x32xbf16>, vector<32x64xbf16>, vector<34x64xf32> -> vector<34x64xf32>
    %21 = arith.truncf %20 : vector<34x64xf32> to vector<34x64xbf16>
    %c0_13 = arith.constant 0 : index
    %c0_14 = arith.constant 0 : index
    %22 = vector.load %arg6[%c0_13, %c0_14] : memref<64x16xbf16, #tpu.memory_space<vmem>>, vector<64x16xbf16>
    %cst_15 = arith.constant dense<0.000000e+00> : vector<34x16xf32>
    %23 = tpu.matmul %21, %22, %cst_15 {dimension_numbers = #tpu.dot_dimension_numbers<[1], [0], [0], [1], [0, 0, 1, 1], [], []>} : vector<34x64xbf16>, vector<64x16xbf16>, vector<34x16xf32> -> vector<34x16xf32>
    %c0_16 = arith.constant 0 : index
    %c0_17 = arith.constant 0 : index
    %24 = vector.load %arg3[%c0_16, %c0_17] : memref<10x68xbf16, #tpu.memory_space<vmem>>, vector<10x68xbf16>
    %25 = arith.truncf %12 : vector<68x16xf32> to vector<68x16xbf16>
    %cst_18 = arith.constant dense<0.000000e+00> : vector<10x16xf32>
    %26 = tpu.matmul %24, %25, %cst_18 {dimension_numbers = #tpu.dot_dimension_numbers<[1], [0], [0], [1], [0, 0, 1, 1], [], []>} : vector<10x68xbf16>, vector<68x16xbf16>, vector<10x16xf32> -> vector<10x16xf32>
    %27 = arith.truncf %26 : vector<10x16xf32> to vector<10x16xbf16>
    %c0_19 = arith.constant 0 : index
    %c0_20 = arith.constant 0 : index
    %28 = vector.load %arg7[%c0_19, %c0_20] : memref<16x32xbf16, #tpu.memory_space<vmem>>, vector<16x32xbf16>
    %cst_21 = arith.constant dense<0.000000e+00> : vector<10x32xf32>
    %29 = tpu.matmul %27, %28, %cst_21 {dimension_numbers = #tpu.dot_dimension_numbers<[1], [0], [0], [1], [0, 0, 1, 1], [], []>} : vector<10x16xbf16>, vector<16x32xbf16>, vector<10x32xf32> -> vector<10x32xf32>
    %30 = vector.extract_strided_slice %29 {offsets = [0, 0], sizes = [2, 32], strides = [1, 1]} : vector<10x32xf32> to vector<2x32xf32>
    %31 = vector.extract_strided_slice %29 {offsets = [8, 0], sizes = [2, 32], strides = [1, 1]} : vector<10x32xf32> to vector<2x32xf32>
    %32 = arith.subf %23, %13 : vector<34x16xf32>
    %33 = math.absf %32 : vector<34x16xf32>
    %34 = vector.shape_cast %33 : vector<34x16xf32> to vector<1x34x16xf32>
    %cst_22 = arith.constant dense<0.000000e+00> : vector<1xf32>
    %35 = vector.multi_reduction <add>, %34, %cst_22 [1, 2] : vector<1x34x16xf32> to vector<1xf32>
    %36 = vector.shape_cast %35 : vector<1xf32> to vector<1x1x1xf32>
    %37 = vector.extract %36[0, 0, 0] : f32 from vector<1x1x1xf32>
    %cst_23 = arith.constant 5.440000e+02 : f32
    %38 = arith.divf %37, %cst_23 : f32
    %39 = tpu.iota {dimensions = array<i32: 1>} : vector<34x64xi32>
    %c32_i32 = arith.constant 32 : i32
    %40 = vector.broadcast %c32_i32 : i32 to vector<34x64xi32>
    %41 = arith.cmpi slt, %39, %40 : vector<34x64xi32>
    %42 = arith.mulf %20, %20 : vector<34x64xf32>
    %43 = math.exp %20 : vector<34x64xf32>
    %cst_24 = arith.constant 1.000000e+00 : f32
    %44 = vector.broadcast %cst_24 : f32 to vector<34x64xf32>
    %45 = arith.subf %43, %44 : vector<34x64xf32>
    %46 = arith.subf %45, %20 : vector<34x64xf32>
    %47 = arith.select %41, %42, %46 : vector<34x64xi1>, vector<34x64xf32>
    %48 = vector.shape_cast %47 : vector<34x64xf32> to vector<1x34x64xf32>
    %cst_25 = arith.constant dense<0.000000e+00> : vector<1xf32>
    %49 = vector.multi_reduction <add>, %48, %cst_25 [1, 2] : vector<1x34x64xf32> to vector<1xf32>
    %50 = vector.shape_cast %49 : vector<1xf32> to vector<1x1x1xf32>
    %51 = vector.extract %50[0, 0, 0] : f32 from vector<1x1x1xf32>
    %cst_26 = arith.constant 5.000000e-01 : f32
    %52 = arith.mulf %cst_26, %51 : f32
    %cst_27 = arith.constant 1.088000e+03 : f32
    %53 = arith.divf %52, %cst_27 : f32
    %54 = arith.mulf %31, %30 : vector<2x32xf32>
    %cst_28 = arith.constant dense<0.000000e+00> : vector<2xf32>
    %55 = vector.multi_reduction <add>, %54, %cst_28 [1] : vector<2x32xf32> to vector<2xf32>
    %56 = vector.shape_cast %55 : vector<2xf32> to vector<2x1xf32>
    %57 = arith.mulf %31, %31 : vector<2x32xf32>
    %cst_29 = arith.constant dense<0.000000e+00> : vector<2xf32>
    %58 = vector.multi_reduction <add>, %57, %cst_29 [1] : vector<2x32xf32> to vector<2xf32>
    %59 = vector.shape_cast %58 : vector<2xf32> to vector<2x1xf32>
    %60 = math.sqrt %59 : vector<2x1xf32>
    %cst_30 = arith.constant 9.99999993E-9 : f32
    %61 = vector.broadcast %cst_30 : f32 to vector<2x1xf32>
    %62 = arith.maximumf %60, %61 : vector<2x1xf32>
    %63 = arith.mulf %30, %30 : vector<2x32xf32>
    %cst_31 = arith.constant dense<0.000000e+00> : vector<2xf32>
    %64 = vector.multi_reduction <add>, %63, %cst_31 [1] : vector<2x32xf32> to vector<2xf32>
    %65 = vector.shape_cast %64 : vector<2xf32> to vector<2x1xf32>
    %66 = math.sqrt %65 : vector<2x1xf32>
    %cst_32 = arith.constant 9.99999993E-9 : f32
    %67 = vector.broadcast %cst_32 : f32 to vector<2x1xf32>
    %68 = arith.maximumf %66, %67 : vector<2x1xf32>
    %69 = arith.mulf %62, %68 : vector<2x1xf32>
    %70 = arith.divf %56, %69 : vector<2x1xf32>
    %cst_33 = arith.constant 1.000000e+00 : f32
    %71 = vector.broadcast %cst_33 : f32 to vector<2x1xf32>
    %72 = arith.subf %71, %70 : vector<2x1xf32>
    %73 = vector.shape_cast %72 : vector<2x1xf32> to vector<1x2x1xf32>
    %cst_34 = arith.constant dense<0.000000e+00> : vector<1xf32>
    %74 = vector.multi_reduction <add>, %73, %cst_34 [1, 2] : vector<1x2x1xf32> to vector<1xf32>
    %75 = vector.shape_cast %74 : vector<1xf32> to vector<1x1x1xf32>
    %76 = vector.extract %75[0, 0, 0] : f32 from vector<1x1x1xf32>
    %cst_35 = arith.constant 2.000000e+00 : f32
    %77 = arith.divf %76, %cst_35 : f32
    %cst_36 = arith.constant 1.000000e+01 : f32
    %78 = arith.mulf %cst_36, %38 : f32
    %cst_37 = arith.constant 1.000000e+00 : f32
    %79 = arith.mulf %cst_37, %53 : f32
    %80 = arith.addf %78, %79 : f32
    %cst_38 = arith.constant 1.000000e+00 : f32
    %81 = arith.mulf %cst_38, %77 : f32
    %82 = arith.addf %80, %81 : f32
    %83 = tpu.iota {dimensions = array<i32: 0>} : vector<34x96xi32>
    %84 = tpu.iota {dimensions = array<i32: 1>} : vector<34x96xi32>
    %c0_i32 = arith.constant 0 : i32
    %85 = vector.broadcast %c0_i32 : i32 to vector<34x96xi32>
    %86 = arith.cmpi eq, %83, %85 : vector<34x96xi32>
    %c0_i32_39 = arith.constant 0 : i32
    %87 = vector.broadcast %c0_i32_39 : i32 to vector<34x96xi32>
    %88 = arith.cmpi eq, %84, %87 : vector<34x96xi32>
    %89 = arith.andi %86, %88 : vector<34x96xi1>
    %cst_40 = arith.constant 0.000000e+00 : f32
    %90 = vector.broadcast %82 : f32 to vector<34x96xf32>
    %91 = vector.broadcast %cst_40 : f32 to vector<34x96xf32>
    %92 = arith.select %89, %90, %91 : vector<34x96xi1>, vector<34x96xf32>
    %93 = tpu.concatenate %13, %23, %92 in 1 : vector<34x16xf32>, vector<34x16xf32>, vector<34x96xf32> -> vector<34x128xf32>
    %c0_41 = arith.constant 0 : index
    %c0_42 = arith.constant 0 : index
    %94 = vector.load %arg8[%c0_41, %c0_42] : memref<34x128xf32, #tpu.memory_space<vmem>>, vector<34x128xf32>
    tpu.vector_store %arg8[%c0_41, %c0_42], %93 {strides = array<i32>} : memref<34x128xf32, #tpu.memory_space<vmem>>, vector<34x128xf32>,
    return
  }
}

</mosaic_0001>

<bundles_post_ra>
// kernel: vc_forward.1
= control target key start
LH: loop header
LB: loop body
LE: loop exit
PB: predicated region body
PF: predicated region fallthrough
CT: control target
= control target key end

     0   :  { %vm94_vm0 = vcmask 523264   ;;  %s1137_s22 = smov 64   ;;  %s1425_s1 = inlined_call_operand.vmem [shape: bf16[64,128], index: 1, kind: input, shape index: {}]   ;;  %s1426_s0 = inlined_call_operand.vmem [shape: bf16[68,64], index: 0, kind: input, shape index: {}]   ;;  %s1427_s2 = inlined_call_operand.vmem [shape: bf16[128,16], index: 2, kind: input, shape index: {}]   ;;  %s1428_s4 = inlined_call_operand.vmem [shape: bf16[16,32], index: 4, kind: input, shape index: {}]   ;;  %s1429_s5 = inlined_call_operand.vmem [shape: bf16[32,64], index: 5, kind: input, shape index: {}]   ;;  %s1430_s6 = inlined_call_operand.vmem [shape: bf16[64,16], index: 6, kind: input, shape index: {}]   ;;  %s1431_s3 = inlined_call_operand.vmem [shape: bf16[10,68], index: 3, kind: input, shape index: {}]   ;;  %s1432_s7 = inlined_call_operand.vmem [shape: bf16[16,32], index: 7, kind: input, shape index: {}]   ;;  %s1433_s8 = inlined_call_operand.vmem [shape: f32[34,128], index: 8, kind: output, shape index: {}]  }
   0x1   :  { %v1022_v0 = vld [vmem:[%s1425_s1 + $0x18] sm:$0xff]  ;;  %v1021_v1 = vld [vmem:[%s1425_s1 + $0x10] sm:$0xff]  ;;  %v1020_v2 = vld [vmem:[%s1425_s1 + $0x8] sm:$0xff] }
   0x2   :  { %114 = vmatpush.bf16.msra.mxu0 %v1022_v0  ;;  %v1019_v3 = vld [vmem:[%s1425_s1] sm:$0xff]  ;;  %v1016_v5 = vld [vmem:[%s1426_s0 + $0x8] sm:$0xff]  ;;  %v1017_v6 = vld [vmem:[%s1426_s0 + $0x10] sm:$0xff] }
   0x3   :  { %v1015_v4 = vld [vmem:[%s1426_s0] sm:$0xff]  ;;  %v1018_v7 = vld [vmem:[%s1426_s0 + $0x18] sm:$0xff]  ;;  %v1029_v31 = vld [vmem:[%s1427_s2 + $0x30] sm:$0xff] }
   0x4   :  { %v38_v8 = vld [vmem:[%s1426_s0 + $0x20] sm:$0x3]  ;;  %v1030_v30 = vld [vmem:[%s1427_s2 + $0x38] sm:$0xff]  ;;  %v1028_v32 = vld [vmem:[%s1427_s2 + $0x28] sm:$0xff] }
   0x5   :  { %v64_v9 = vunpack.c.l.b16 %v38_v8  ;;  %356 = vmatpush.bf16.msra.mxu1 %v1030_v30  ;;  %v1027_v33 = vld [vmem:[%s1427_s2 + $0x20] sm:$0xff]  ;;  %v1026_v34 = vld [vmem:[%s1427_s2 + $0x18] sm:$0xff]  ;;  %v1025_v35 = vld [vmem:[%s1427_s2 + $0x10] sm:$0xff] }
   0x6   :  { %115 = vmatpush.bf16.msra.mxu0 %v1021_v1  ;;  %v1024_v36 = vld [vmem:[%s1427_s2 + $0x8] sm:$0xff]  ;;  %v1023_v37 = vld [vmem:[%s1427_s2] sm:$0xff] }
   0x7   :  { %v69_v10 = vpack.c.b16 %v64_v9, %v64_v9 }
   0x9   :  { %357 = vmatpush.bf16.msra.mxu1 %v1029_v31 }
   0xa   :  { %116 = vmatpush.bf16.msra.mxu0 %v1020_v2 }
   0xd   :  { %358 = vmatpush.bf16.msra.mxu1 %v1028_v32 }
   0xe   :  { %117 = vmatpush.bf16.msra.mxu0 %v1019_v3 }
  0x11   :  { %926 = vmatmul.msk.bf16.vlgmr.msra.gmra.mxu0 %vm94_vm0, %v1015_v4  ;;  %359 = vmatpush.bf16.msra.mxu1 %v1027_v33 }
  0x15   :  { %360 = vmatpush.bf16.msra.mxu1 %v1026_v34 }
  0x19   :  { %361 = vmatpush.bf16.msra.mxu1 %v1025_v35 }
  0x1d   :  { %362 = vmatpush.bf16.msra.mxu1 %v1024_v36 }
  0x21   :  { %927 = vmatmul.msk.bf16.gmra.mxu0 %vm94_vm0, %v1016_v5  ;;  %363 = vmatpush.bf16.msra.mxu1 %v1023_v37 }
  0x31   :  { %928 = vmatmul.msk.bf16.gmra.mxu0 %vm94_vm0, %v1017_v6 }
  0x41   :  { %929 = vmatmul.msk.bf16.gmra.mxu0 %vm94_vm0, %v1018_v7 }
  0x51   :  { %930 = vmatmul.msk.bf16.gmra.mxu0 %vm94_vm0, %v69_v10 }
  0x8e   :  { %v119_v11 = vpop.f32.mrf.mxu0 }
  0x8f   :  { %v143_v12 = vmul.f32 %v119_v11, %v119_v11 }
  0x91   :  { %152 = vrot.lane.b32.xlu0 %v143_v12, %s1137_s22 }
  0x96   :  { %v121_v13 = vpop.f32.mrf.mxu0 }
  0x97   :  { %v144_v14 = vmul.f32 %v121_v13, %v121_v13 }
  0x99   :  { %154 = vrot.lane.b32.xlu0 %v144_v14, %s1137_s22 }
  0x9e   :  { %v124_v15 = vpop.f32.mrf.mxu0 }
  0x9f   :  { %v145_v16 = vmul.f32 %v124_v15, %v124_v15 }
  0xa1   :  { %156 = vrot.lane.b32.xlu1 %v145_v16, %s1137_s22 }
  0xa6   :  { %v126_v17 = vpop.f32.mrf.mxu0 }
  0xa7   :  { %v1221_v18 = vmul.f32 %v126_v17, %v126_v17 }
  0xa9   :  { %158 = vrot.lane.b32.xlu1 %v1221_v18, %s1137_s22 }
  0xae   :  { %v129_v19 = vpop.f32.mrf.mxu0 }
  0xaf   :  { %v147_v20 = vmul.f32 %v129_v19, %v129_v19 }
  0xb1   :  { %160 = vrot.lane.b32.xlu2 %v147_v20, %s1137_s22 }
  0xb6   :  { %v131_v21 = vpop.f32.mrf.mxu0 }
  0xb7   :  { %v148_v22 = vmul.f32 %v131_v21, %v131_v21 }
  0xb9   :  { %162 = vrot.lane.b32.xlu2 %v148_v22, %s1137_s22 }
  0xbe   :  { %v134_v23 = vpop.f32.mrf.mxu0 }
  0xbf   :  { %v1224_v24 = vmul.f32 %v134_v23, %v134_v23 }
  0xc1   :  { %164 = vrot.lane.b32.xlu0 %v1224_v24, %s1137_s22 }
  0xc6   :  { %v136_v25 = vpop.f32.mrf.mxu0 }
  0xc7   :  { %v1227_v26 = vmul.f32 %v136_v25, %v136_v25 }
  0xc9   :  { %166 = vrot.lane.b32.xlu1 %v1227_v26, %s1137_s22 }
  0xce   :  { %v139_v27 = vpop.f32.mrf.mxu0 }
  0xcf   :  { %v1230_v28 = vmul.f32 %v139_v27, %v139_v27 }
  0xd1   :  { %168 = vrot.lane.b32.xlu2 %v1230_v28, %s1137_s22 }
  0xd6   :  { %v141_v29 = vpop.f32.mrf.mxu0 }
 0x103   :  { %v153_v38 = vpop.permute.xlu0 %152 }
 0x104   :  { %v170_v39 = vadd.f32 %v153_v38, %v143_v12 }
 0x106   :  { %1069 = vrsqrt.f32 %v170_v39  ;;  %vm186_vm1 = vcmp.eq.f32.partialorder %v170_v39, inf  ;;  %v189_v4 = vand.u32 2147483648, %v170_v39  ;;  %vm188_vm3 = vcmp.eq.f32.partialorder %v170_v39, 0.0 }
 0x10b   :  { %v155_v40 = vpop.permute.xlu0 %154  ;;  %v161_v41 = vpop.permute.xlu2 %160 }
 0x10c   :  { %v1070_v42 = vpop.eup %1069  ;;  %v171_v43 = vadd.f32 %v155_v40, %v144_v14  ;;  %v1262_v56 = vadd.f32 %v161_v41, %v147_v20 }
 0x10d   :  { %v180_v44 = vmul.f32 %v1070_v42, %v170_v39 }
 0x10e   :  { %1071 = vrsqrt.f32 %v171_v43  ;;  %vm198_vm2 = vcmp.eq.f32.partialorder %v171_v43, inf  ;;  %v201_v5 = vand.u32 2147483648, %v171_v43  ;;  %vm200_vm4 = vcmp.eq.f32.partialorder %v171_v43, 0.0 }
 0x10f   :  { %v181_v45 = vmul.f32 %v1070_v42, %v180_v44  ;;  %vm234_vm10 = vcmp.eq.f32.partialorder %v1262_v56, inf  ;;  %vm236_vm12 = vcmp.eq.f32.partialorder %v1262_v56, 0.0 }
 0x111   :  { %v182_v46 = vmul.f32 0.5, %v181_v45 }
 0x113   :  { %v157_v47 = vpop.permute.xlu1 %156  ;;  %v183_v48 = vsub.f32 1.5, %v182_v46  ;;  %v163_v51 = vpop.permute.xlu2 %162 }
 0x114   :  { %v1072_v49 = vpop.eup %1071  ;;  %v1257_v50 = vadd.f32 %v157_v47, %v145_v16  ;;  %v1260_v55 = vadd.f32 %v163_v51, %v148_v22 }
 0x115   :  { %v192_v52 = vmul.f32 %v1072_v49, %v171_v43  ;;  %v184_v53 = vmul.f32 %v1070_v42, %v183_v48 }
 0x116   :  { %1073 = vrsqrt.f32 %v1257_v50  ;;  %vm210_vm5 = vcmp.eq.f32.partialorder %v1257_v50, inf  ;;  %v213_v33 = vand.u32 2147483648, %v1257_v50  ;;  %vm212_vm7 = vcmp.eq.f32.partialorder %v1257_v50, 0.0 }
 0x117   :  { %v193_v54 = vmul.f32 %v1072_v49, %v192_v52  ;;  %v185_v59 = vmul.f32 %v184_v53, %v170_v39  ;;  %1075 = vrsqrt.f32 %v1260_v55  ;;  %vm246_vm9 = vcmp.eq.f32.partialorder %v1260_v55, inf }
 0x118   :  { %1077 = vrsqrt.f32 %v1262_v56  ;;  %vm248_vm11 = vcmp.eq.f32.partialorder %v1260_v55, 0.0 }
 0x119   :  { %v194_v57 = vmul.f32 0.5, %v193_v54  ;;  %v187_v1 = vsel %vm186_vm1, %v170_v39, %v185_v59 }
 0x11a   :  { %v190_v9 = vsel %vm188_vm3, %v189_v4, %v187_v1 }
 0x11b   :  { %v159_v58 = vpop.permute.xlu1 %158  ;;  %v195_v60 = vsub.f32 1.5, %v194_v57 }
 0x11c   :  { %v1074_v61 = vpop.eup %1073  ;;  %v173_v62 = vadd.f32 %v159_v58, %v1221_v18  ;;  %v237_v58 = vand.u32 2147483648, %v1262_v56 }
 0x11d   :  { %v196_v63 = vmul.f32 %v1072_v49, %v195_v60  ;;  %v204_v0 = vmul.f32 %v1074_v61, %v1257_v50  ;;  %v1076_v8 = vpop.eup %1075 }
 0x11e   :  { %1079 = vrsqrt.f32 %v173_v62  ;;  %v1078_v11 = vpop.eup %1077  ;;  %v240_v16 = vmul.f32 %v1076_v8, %v1260_v55  ;;  %vm222_vm6 = vcmp.eq.f32.partialorder %v173_v62, inf  ;;  %v225_v34 = vand.u32 2147483648, %v173_v62 }
 0x11f   :  { %v197_v2 = vmul.f32 %v196_v63, %v171_v43  ;;  %v205_v3 = vmul.f32 %v1074_v61, %v204_v0  ;;  %v228_v19 = vmul.f32 %v1078_v11, %v1262_v56  ;;  %vm224_vm8 = vcmp.eq.f32.partialorder %v173_v62, 0.0 }
 0x120   :  { %v241_v21 = vmul.f32 %v1076_v8, %v240_v16 }
 0x121   :  { %v199_v6 = vsel %vm198_vm2, %v171_v43, %v197_v2  ;;  %v206_v7 = vmul.f32 0.5, %v205_v3  ;;  %v229_v25 = vmul.f32 %v1078_v11, %v228_v19 }
 0x122   :  { %v202_v10 = vsel %vm200_vm4, %v201_v5, %v199_v6  ;;  %v242_v29 = vmul.f32 0.5, %v241_v21  ;;  %vm418_vm4 = vcmask 130048  }
 0x123   :  { %v287_v12 = vpack.c.bf16 %v202_v10, %v190_v9  ;;  %v207_v13 = vsub.f32 1.5, %v206_v7  ;;  %v230_v32 = vmul.f32 0.5, %v229_v25 }
 0x124   :  { %v1080_v14 = vpop.eup %1079  ;;  %v243_v36 = vsub.f32 1.5, %v242_v29 }
 0x125   :  { %364 = vmatmul.bf16.vlgmr.msra.gmra.mxu1 %v287_v12  ;;  %v216_v15 = vmul.f32 %v1080_v14, %v173_v62  ;;  %v208_v17 = vmul.f32 %v1074_v61, %v207_v13  ;;  %v231_v42 = vsub.f32 1.5, %v230_v32 }
 0x126   :  { %v244_v44 = vmul.f32 %v1076_v8, %v243_v36 }
 0x127   :  { %v217_v18 = vmul.f32 %v1080_v14, %v216_v15  ;;  %v209_v22 = vmul.f32 %v208_v17, %v1257_v50  ;;  %v232_v46 = vmul.f32 %v1078_v11, %v231_v42 }
 0x128   :  { %v245_v47 = vmul.f32 %v244_v44, %v1260_v55 }
 0x129   :  { %v218_v20 = vmul.f32 0.5, %v217_v18  ;;  %v211_v30 = vsel %vm210_vm5, %v1257_v50, %v209_v22  ;;  %v233_v49 = vmul.f32 %v232_v46, %v1262_v56  ;;  %vm589_vm5 = vcmask 1041408  }
 0x12a   :  { %v214_v37 = vsel %vm212_vm7, %v213_v33, %v211_v30  ;;  %v247_v52 = vsel %vm246_vm9, %v1260_v55, %v245_v47  ;;  %vm585_vm7 = vcmask 556032   ;;  %vm711_vm9 = vcmask 517120  }
 0x12b   :  { %v219_v23 = vsub.f32 1.5, %v218_v20  ;;  %v169_v41 = vpop.permute.xlu2 %168  ;;  %v235_v53 = vsel %vm234_vm10, %v1262_v56, %v233_v49  ;;  %v1032_v49 = vld [vmem:[%s1429_s5] sm:$0xff]  ;;  %vm650_vm10 = vcmask 123904  }
 0x12c   :  { %v178_v45 = vadd.f32 %v169_v41, %v1230_v28  ;;  %v249_v28 = vand.u32 2147483648, %v1260_v55  ;;  %v238_v60 = vsel %vm236_vm12, %v237_v58, %v235_v53 }
 0x12d   :  { %v220_v27 = vmul.f32 %v1080_v14, %v219_v23  ;;  %v1031_v23 = vld [vmem:[%s1428_s4] sm:$0xff] }
 0x12e   :  { %v250_v59 = vsel %vm248_vm11, %v249_v28, %v247_v52  ;;  %vm282_vm2 = vcmp.eq.f32.partialorder %v178_v45, inf  ;;  %v285_v19 = vand.u32 2147483648, %v178_v45  ;;  %vm284_vm3 = vcmp.eq.f32.partialorder %v178_v45, 0.0  ;;  %435 = vmatpush.bf16.msra.mxu2 %v1031_v23 }
 0x12f   :  { %v221_v31 = vmul.f32 %v220_v27, %v173_v62  ;;  %v289_v61 = vpack.c.bf16 %v250_v59, %v238_v60 }
 0x131   :  { %v223_v35 = vsel %vm222_vm6, %v173_v62, %v221_v31  ;;  %vm475_vm6 = vcmask 261120  }
 0x132   :  { %v226_v38 = vsel %vm224_vm8, %v225_v34, %v223_v35 }
 0x133   :  { %v165_v39 = vpop.permute.xlu0 %164  ;;  %v288_v40 = vpack.c.bf16 %v226_v38, %v214_v37 }
 0x134   :  { %v176_v43 = vadd.f32 %v165_v39, %v1224_v24 }
 0x135   :  { %369 = vmatmul.bf16.gmra.mxu1 %v288_v40 }
 0x136   :  { %1081 = vrsqrt.f32 %v176_v43  ;;  %vm258_vm13 = vcmp.eq.f32.partialorder %v176_v43, inf  ;;  %v261_v11 = vand.u32 2147483648, %v176_v43  ;;  %vm260_vm15 = vcmp.eq.f32.partialorder %v176_v43, 0.0 }
 0x137   :  { %1083 = vrsqrt.f32 %v178_v45 }
 0x13b   :  { %v167_v48 = vpop.permute.xlu1 %166 }
 0x13c   :  { %v1082_v50 = vpop.eup %1081  ;;  %v177_v51 = vadd.f32 %v167_v48, %v1227_v26  ;;  %v1033_v48 = vld [vmem:[%s1429_s5 + $0x8] sm:$0xff] }
 0x13d   :  { %v252_v24 = vmul.f32 %v1082_v50, %v176_v43  ;;  %v1084_v57 = vpop.eup %1083  ;;  %491 = vmatpush.bf16.msra.mxu3 %v1033_v48 }
 0x13e   :  { %1085 = vrsqrt.f32 %v177_v51  ;;  %v276_v63 = vmul.f32 %v1084_v57, %v178_v45  ;;  %vm270_vm14 = vcmp.eq.f32.partialorder %v177_v51, inf  ;;  %v273_v12 = vand.u32 2147483648, %v177_v51 }
 0x13f   :  { %v253_v54 = vmul.f32 %v1082_v50, %v252_v24  ;;  %vm272_vm1 = vcmp.eq.f32.partialorder %v177_v51, 0.0 }
 0x140   :  { %v277_v4 = vmul.f32 %v1084_v57, %v276_v63 }
 0x141   :  { %v254_v26 = vmul.f32 0.5, %v253_v54  ;;  %492 = vmatpush.bf16.msra.mxu3 %v1032_v49 }
 0x142   :  { %v278_v7 = vmul.f32 0.5, %v277_v4 }
 0x143   :  { %v255_v62 = vsub.f32 1.5, %v254_v26 }
 0x144   :  { %v1086_v0 = vpop.eup %1085  ;;  %v279_v56 = vsub.f32 1.5, %v278_v7 }
 0x145   :  { %374 = vmatmul.bf16.gmra.mxu1 %v289_v61  ;;  %v264_v1 = vmul.f32 %v1086_v0, %v177_v51  ;;  %v256_v2 = vmul.f32 %v1082_v50, %v255_v62 }
 0x146   :  { %v280_v17 = vmul.f32 %v1084_v57, %v279_v56 }
 0x147   :  { %v265_v3 = vmul.f32 %v1086_v0, %v264_v1  ;;  %v257_v55 = vmul.f32 %v256_v2, %v176_v43 }
 0x148   :  { %v281_v18 = vmul.f32 %v280_v17, %v178_v45  ;;  %v1037_v17 = vld [vmem:[%s1430_s6 + $0x18] sm:$0xff] }
 0x149   :  { %v266_v5 = vmul.f32 0.5, %v265_v3  ;;  %v259_v9 = vsel %vm258_vm13, %v176_v43, %v257_v55  ;;  %556 = vmatpush.bf16.msrb.mxu2 %v1037_v17 }
 0x14a   :  { %v262_v14 = vsel %vm260_vm15, %v261_v11, %v259_v9  ;;  %v283_v20 = vsel %vm282_vm2, %v178_v45, %v281_v18 }
 0x14b   :  { %v267_v6 = vsub.f32 1.5, %v266_v5  ;;  %v286_v21 = vsel %vm284_vm3, %v285_v19, %v283_v20 }
 0x14c   :  { %v291_v22 = vpack.c.bf16 %v286_v21, %v286_v21  ;;  %v1002_v21 = vld [vmem:[%s1431_s3] sm:$0xf] }
 0x14d   :  { %v268_v8 = vmul.f32 %v1086_v0, %v267_v6 }
 0x14f   :  { %v269_v10 = vmul.f32 %v268_v8, %v177_v51 }
 0x151   :  { %v271_v13 = vsel %vm270_vm14, %v177_v51, %v269_v10 }
 0x152   :  { %v274_v15 = vsel %vm272_vm1, %v273_v12, %v271_v13 }
 0x153   :  { %v290_v16 = vpack.c.bf16 %v274_v15, %v262_v14 }
 0x155   :  { %379 = vmatmul.bf16.gmra.mxu1 %v290_v16 }
 0x165   :  { %384 = vmatmul.bf16.gmra.mxu1 %v291_v22  ;;  %v1038_v22 = vld [vmem:[%s1431_s3] sm:$0x10] }
 0x166   :  { %v1003_v23 = vor.u32 %v1038_v22, %v1002_v21 }
 0x1a2   :  { %v365_v25 = vpop.f32.mrf.mxu1 }
 0x1a3   :  { %v366_v27 = vadd.f32 1e-09, %v365_v25  ;;  %v1036_v25 = vld [vmem:[%s1430_s6 + $0x10] sm:$0xff] }
 0x1a4   :  { %557 = vmatpush.bf16.msrb.mxu2 %v1036_v25 }
 0x1a5   :  { %1087 = vlog2.f32 %v366_v27  ;;  %v1035_v27 = vld [vmem:[%s1430_s6 + $0x8] sm:$0xff] }
 0x1a8   :  { %558 = vmatpush.bf16.msrb.mxu2 %v1035_v27 }
 0x1aa   :  { %v367_v29 = vpop.f32.mrf.mxu1 }
 0x1ab   :  { %v368_v30 = vadd.f32 1e-09, %v367_v29  ;;  %v1088_v31 = vpop.eup %1087  ;;  %v1034_v29 = vld [vmem:[%s1430_s6] sm:$0xff]  ;;  %s1138_s6 = smov 16  }
 0x1ac   :  { %v1291_v34 = vmul.f32 0.6931472, %v1088_v31  ;;  %559 = vmatpush.bf16.msrb.mxu2 %v1034_v29 }
 0x1ad   :  { %1089 = vlog2.f32 %v368_v30 }
 0x1b2   :  { %v370_v32 = vpop.f32.mrf.mxu1 }
 0x1b3   :  { %v1090_v33 = vpop.eup %1089  ;;  %v371_v37 = vadd.f32 1e-09, %v370_v32 }
 0x1b4   :  { %v1293_v35 = vmul.f32 0.6931472, %v1090_v33 }
 0x1b5   :  { %1091 = vlog2.f32 %v371_v37 }
 0x1b6   :  { %v407_v36 = vpack.c.bf16 %v1293_v35, %v1291_v34 }
 0x1b8   :  { %967 = vmatmul.msk.bf16.vlgmr.msra.gmra.mxu2 %vm418_vm4, %v407_v36 }
 0x1ba   :  { %v372_v38 = vpop.f32.mrf.mxu1 }
 0x1bb   :  { %v373_v39 = vadd.f32 1e-09, %v372_v38  ;;  %v1092_v40 = vpop.eup %1091  ;;  %v671_v38 = vlaneseq }
 0x1bc   :  { %v1298_v43 = vmul.f32 0.6931472, %v1092_v40  ;;  %v1039_v40 = vld [vmem:[%s1432_s7] sm:$0xff]  ;;  %s1140_s7 = smov 32  }
 0x1bd   :  { %1093 = vlog2.f32 %v373_v39 }
 0x1c2   :  { %v375_v41 = vpop.f32.mrf.mxu1 }
 0x1c3   :  { %v1094_v42 = vpop.eup %1093  ;;  %v376_v45 = vadd.f32 1e-09, %v375_v41  ;;  %v1343_v41 = vand.u32 127, %v671_v38 }
 0x1c4   :  { %v1300_v44 = vmul.f32 0.6931472, %v1094_v42 }
 0x1c5   :  { %1095 = vlog2.f32 %v376_v45  ;;  %vm673_vm8 = vcmp.lt.s32.totalorder %v1343_v41, 32 }
 0x1c6   :  { %v408_v46 = vpack.c.bf16 %v1300_v44, %v1298_v43 }
 0x1c8   :  { %968 = vmatmul.msk.bf16.gmra.mxu2 %vm418_vm4, %v408_v46 }
 0x1ca   :  { %v377_v47 = vpop.f32.mrf.mxu1 }
 0x1cb   :  { %v1096_v50 = vpop.eup %1095  ;;  %v378_v59 = vadd.f32 1e-09, %v377_v47 }
 0x1cc   :  { %v1311_v51 = vmul.f32 0.6931472, %v1096_v50 }
 0x1ce   :  { %v409_v24 = vpack.c.bf16 %v1311_v51, %v1311_v51 }
 0x1d2   :  { %v380_v52 = vpop.f32.mrf.mxu1 }
 0x1d3   :  { %v381_v58 = vadd.f32 1e-09, %v380_v52 }
 0x1d8   :  { %969 = vmatmul.msk.bf16.gmra.mxu2 %vm418_vm4, %v409_v24 }
 0x1da   :  { %v382_v28 = vpop.f32.mrf.mxu1 }
 0x1db   :  { %v383_v53 = vadd.f32 1e-09, %v382_v28 }
 0x1e2   :  { %v385_v54 = vpop.f32.mrf.mxu1 }
 0x1e3   :  { %v386_v57 = vadd.f32 1e-09, %v385_v54 }
 0x1e5   :  { %1097 = vlog2.f32 %v386_v57 }
 0x1e6   :  { %1099 = vlog2.f32 %v383_v53 }
 0x1e7   :  { %1101 = vlog2.f32 %v381_v58 }
 0x1e8   :  { %1103 = vlog2.f32 %v378_v59 }
 0x1ea   :  { %v387_v26 = vpop.f32.mrf.mxu1 }
 0x1eb   :  { %v1098_v60 = vpop.eup %1097 }
 0x1ec   :  { %v1100_v61 = vpop.eup %1099  ;;  %v406_v62 = vmul.f32 0.6931472, %v1098_v60 }
 0x1ed   :  { %v1102_v63 = vpop.eup %1101  ;;  %v404_v1 = vmul.f32 0.6931472, %v1100_v61 }
 0x1ee   :  { %v579_v0 = vpack.c.bf16 %v406_v62, %v406_v62  ;;  %v1104_v2 = vpop.eup %1103  ;;  %v402_v4 = vmul.f32 0.6931472, %v1102_v63 }
 0x1ef   :  { %v400_v5 = vmul.f32 0.6931472, %v1104_v2 }
 0x1f0   :  { %v591_v3 = vsel %vm589_vm5, %v579_v0, 0  ;;  %v578_v55 = vpack.c.bf16 %v404_v1, %v402_v4 }
 0x1f1   :  { %596 = vmatpush.bf16.msrb.mxu3 %v591_v3  ;;  %v577_v6 = vpack.c.bf16 %v400_v5, %v1311_v51 }
 0x1f5   :  { %597 = vmatpush.bf16.msrb.mxu3 %v578_v55 }
 0x1f9   :  { %598 = vmatpush.bf16.msrb.mxu3 %v577_v6 }
 0x1fd   :  { %599 = vmatpush.bf16.msrb.mxu3 %v408_v46 }
 0x201   :  { %600 = vmatpush.bf16.msrb.mxu3 %v407_v36 }
 0x23b   :  { %v437_v7 = vpop.f32.mrf.mxu2 }
 0x23c   :  { %1105 = vtanh.f32 %v437_v7 }
 0x242   :  { %v1106_v9 = vpop.eup %1105 }
 0x243   :  { %v439_v8 = vpop.f32.mrf.mxu2 }
 0x244   :  { %1107 = vtanh.f32 %v439_v8 }
 0x24a   :  { %v1108_v10 = vpop.eup %1107 }
 0x24b   :  { %v442_v56 = vpop.f32.mrf.mxu2  ;;  %v456_v11 = vpack.c.bf16 %v1108_v10, %v1106_v9 }
 0x24c   :  { %1109 = vtanh.f32 %v442_v56 }
 0x24d   :  { %978 = vmatmul.msk.bf16.vlgmr.msra.gmra.mxu3 %vm475_vm6, %v456_v11 }
 0x24e   :  { %626 = vmatpush.bf16.msra.mxu3 %v1039_v40 }
 0x252   :  { %v1110_v13 = vpop.eup %1109 }
 0x253   :  { %v444_v12 = vpop.f32.mrf.mxu2 }
 0x254   :  { %1111 = vtanh.f32 %v444_v12 }
 0x25a   :  { %v1112_v14 = vpop.eup %1111 }
 0x25b   :  { %v447_v15 = vpop.f32.mrf.mxu2  ;;  %v457_v16 = vpack.c.bf16 %v1112_v14, %v1110_v13 }
 0x25c   :  { %1113 = vtanh.f32 %v447_v15 }
 0x25d   :  { %979 = vmatmul.msk.bf16.gmra.mxu3 %vm475_vm6, %v457_v16 }
 0x262   :  { %v1114_v19 = vpop.eup %1113 }
 0x263   :  { %v449_v18 = vpop.f32.mrf.mxu2  ;;  %v458_v20 = vpack.c.bf16 %v1114_v19, %v1114_v19 }
 0x26d   :  { %980 = vmatmul.msk.bf16.gmra.mxu3 %vm475_vm6, %v458_v20 }
 0x27d   :  { %1004 = vmatmul.msk.bf16.vlgmr.msrb.gmra.mxu3 %vm585_vm7, %v1003_v23 }
 0x2d0   :  { %v494_v30 = vpop.f32.mrf.mxu3 }
 0x2d1   :  { %v679_v31 = vmul.f32 1.442695, %v494_v30  ;;  %v674_v48 = vmul.f32 %v494_v30, %v494_v30 }
 0x2d3   :  { %1115 = vpow2.f32 %v679_v31 }
 0x2d8   :  { %v496_v32 = vpop.f32.mrf.mxu3 }
 0x2d9   :  { %v1116_v33 = vpop.eup %1115  ;;  %v508_v36 = vpack.c.bf16 %v496_v32, %v494_v30  ;;  %v681_v37 = vmul.f32 1.442695, %v496_v32  ;;  %v675_v50 = vmul.f32 %v496_v32, %v496_v32 }
 0x2da   :  { %v1010_v39 = vadd.f32 -1.0, %v1116_v33 }
 0x2db   :  { %1117 = vpow2.f32 %v681_v37  ;;  %997 = vmatmul.msk.bf16.vlgmr.msrb.gmra.mxu2 %vm94_vm0, %v508_v36 }
 0x2dc   :  { %v694_v42 = vsub.f32 %v1010_v39, %v494_v30 }
 0x2de   :  { %v699_v24 = vsel %vm673_vm8, %v674_v48, %v694_v42 }
 0x2df   :  { %v704_v53 = vsel %vm94_vm0, %v699_v24, 0.0 }
 0x2e0   :  { %v499_v45 = vpop.f32.mrf.mxu3 }
 0x2e1   :  { %v1118_v46 = vpop.eup %1117  ;;  %v683_v47 = vmul.f32 1.442695, %v499_v45  ;;  %v676_v62 = vmul.f32 %v499_v45, %v499_v45 }
 0x2e2   :  { %v1011_v49 = vadd.f32 -1.0, %v1118_v46 }
 0x2e3   :  { %1119 = vpow2.f32 %v683_v47 }
 0x2e4   :  { %v695_v52 = vsub.f32 %v1011_v49, %v496_v32 }
 0x2e6   :  { %v700_v28 = vsel %vm673_vm8, %v675_v50, %v695_v52 }
 0x2e7   :  { %v705_v54 = vsel %vm94_vm0, %v700_v28, 0.0 }
 0x2e8   :  { %v501_v57 = vpop.f32.mrf.mxu3  ;;  %v706_v58 = vadd.f32 %v705_v54, %v704_v53 }
 0x2e9   :  { %v1120_v59 = vpop.eup %1119  ;;  %v685_v26 = vmul.f32 1.442695, %v501_v57  ;;  %v509_v60 = vpack.c.bf16 %v501_v57, %v499_v45  ;;  %v677_v6 = vmul.f32 %v501_v57, %v501_v57 }
 0x2ea   :  { %v1012_v61 = vadd.f32 -1.0, %v1120_v59 }
 0x2eb   :  { %1121 = vpow2.f32 %v685_v26  ;;  %998 = vmatmul.msk.bf16.gmra.mxu2 %vm94_vm0, %v509_v60 }
 0x2ec   :  { %v696_v63 = vsub.f32 %v1012_v61, %v499_v45 }
 0x2ee   :  { %v701_v0 = vsel %vm673_vm8, %v676_v62, %v696_v63 }
 0x2ef   :  { %v707_v1 = vsel %vm94_vm0, %v701_v0, 0.0  ;;  %v1139_v0 = vmov 0.0  }
 0x2f0   :  { %v504_v2 = vpop.f32.mrf.mxu3  ;;  %v708_v3 = vadd.f32 %v707_v1, %v706_v58  ;;  %v1141_v1 = vmov 544.0  }
 0x2f1   :  { %v1122_v4 = vpop.eup %1121  ;;  %v687_v5 = vmul.f32 1.442695, %v504_v2  ;;  %v510_v12 = vpack.c.bf16 %v504_v2, %v504_v2  ;;  %v678_v14 = vmul.f32 %v504_v2, %v504_v2 }
 0x2f2   :  { %v1013_v55 = vadd.f32 -1.0, %v1122_v4 }
 0x2f3   :  { %1123 = vpow2.f32 %v687_v5 }
 0x2f4   :  { %v697_v7 = vsub.f32 %v1013_v55, %v501_v57  ;;  %1125 = vrcp.f32 %v1141_v1 }
 0x2f6   :  { %v702_v8 = vsel %vm673_vm8, %v677_v6, %v697_v7 }
 0x2f7   :  { %v709_v9 = vsel %vm94_vm0, %v702_v8, 0.0 }
 0x2f8   :  { %v506_v10 = vpop.f32.mrf.mxu3  ;;  %v710_v56 = vadd.f32 %v709_v9, %v708_v3  ;;  %v1142_v3 = vmov 1088.0  }
 0x2f9   :  { %v1124_v11 = vpop.eup %1123 }
 0x2fa   :  { %v1014_v13 = vadd.f32 -1.0, %v1124_v11  ;;  %v1126_v4 = vpop.eup %1125 }
 0x2fb   :  { %999 = vmatmul.msk.bf16.gmra.mxu2 %vm94_vm0, %v510_v12  ;;  %vm734_vm0 = vcmask 254976   ;;  %v663_v8 = vmul.f32 544.0, %v1126_v4  ;;  %vm667_vm11 = vweird.f32 %v1126_v4 }
 0x2fc   :  { %v698_v15 = vsub.f32 %v1014_v13, %v504_v2 }
 0x2fd   :  { %v664_v11 = vsub.f32 1.0, %v663_v8 }
 0x2fe   :  { %v703_v16 = vsel %vm673_vm8, %v678_v14, %v698_v15  ;;  %vm789_vm8 = vcmask 1024  }
 0x2ff   :  { %v712_v17 = vsel %vm711_vm9, %v703_v16, 0.0 }
 0x300   :  { %v602_v18 = vpop.f32.mrf.mxu3  ;;  %v713_v19 = vadd.f32 %v712_v17, %v710_v56 }
 0x308   :  { %v604_v20 = vpop.f32.mrf.mxu3 }
 0x309   :  { %v607_v21 = vpack.c.bf16 %v604_v20, %v602_v18 }
 0x30b   :  { %1009 = vmatmul.msk.bf16.vlgmr.msra.gmra.mxu3 %vm418_vm4, %v607_v21 }
 0x35e   :  { %v561_v22 = vpop.f32.mrf.mxu2 }
 0x35f   :  { %v633_v36 = vsub.f32 %v561_v22, %v1291_v34 }
 0x361   :  { %v638_v45 = vand.u32 2147483647, %v633_v36 }
 0x363   :  { %v643_v28 = vsel %vm418_vm4, %v638_v45, 0.0 }
 0x366   :  { %v563_v23 = vpop.f32.mrf.mxu2 }
 0x367   :  { %v634_v32 = vsub.f32 %v563_v23, %v1293_v35 }
 0x369   :  { %v639_v40 = vand.u32 2147483647, %v634_v32 }
 0x36b   :  { %v644_v49 = vsel %vm418_vm4, %v639_v40, 0.0 }
 0x36c   :  { %v645_v59 = vadd.f32 %v644_v49, %v643_v28 }
 0x36e   :  { %v1363_v25 = vpop.f32.mrf.mxu2 }
 0x36f   :  { %v635_v37 = vsub.f32 %v1363_v25, %v1298_v43 }
 0x371   :  { %v640_v46 = vand.u32 2147483647, %v635_v37 }
 0x373   :  { %v646_v53 = vsel %vm418_vm4, %v640_v46, 0.0 }
 0x374   :  { %v647_v60 = vadd.f32 %v646_v53, %v645_v59 }
 0x376   :  { %v568_v27 = vpop.f32.mrf.mxu2 }
 0x377   :  { %v636_v42 = vsub.f32 %v568_v27, %v1300_v44 }
 0x379   :  { %v641_v50 = vand.u32 2147483647, %v636_v42 }
 0x37b   :  { %v648_v26 = vsel %vm418_vm4, %v641_v50, 0.0 }
 0x37c   :  { %v649_v62 = vadd.f32 %v648_v26, %v647_v60 }
 0x37e   :  { %v571_v29 = vpop.f32.mrf.mxu2 }
 0x37f   :  { %v637_v47 = vsub.f32 %v571_v29, %v1311_v51 }
 0x381   :  { %v642_v54 = vand.u32 2147483647, %v637_v47 }
 0x383   :  { %v651_v61 = vsel %vm650_vm10, %v642_v54, 0.0  ;;  %vm823_vm10 = vcmp.eq.s32.totalorder %v1343_v41, 0 }
 0x384   :  { %v652_v63 = vadd.f32 %v651_v61, %v649_v62 }
 0x386   :  { %v573_v30 = vpop.f32.mrf.mxu2 }
 0x38e   :  { %v628_v31 = vpop.f32.mrf.mxu3 }
 0x38f   :  { %v755_v33 = vmul.f32 %v628_v31, %v628_v31 }
 0x391   :  { %v756_v39 = vsel %vm734_vm0, %v755_v33, 0.0 }
 0x392   :  { %757 = vadd.xlane.f32.xlu1 %v756_v39 }
 0x396   :  { %v630_v48 = vpop.f32.mrf.mxu3 }
 0x397   :  { %v733_v52 = vmul.f32 %v630_v48, %v628_v31  ;;  %v738_v24 = vmul.f32 %v630_v48, %v630_v48 }
 0x399   :  { %v739_v57 = vsel %vm734_vm0, %v738_v24, 0.0  ;;  %v735_v58 = vsel %vm734_vm0, %v733_v52, 0.0 }
 0x39a   :  { %740 = vadd.xlane.f32.xlu0 %v739_v57  ;;  %736 = vadd.xlane.f32.xlu2 %v735_v58 }
 0x3a2   :  { %714 = vadd.xlane.f32.xlu0 %v713_v19  ;;  %653 = vadd.xlane.f32.xlu2 %v652_v63  ;;  %v665_v19 = vmul.f32 %v1126_v4, %v664_v11 }
 0x3a4   :  { %v666_v32 = vadd.f32 %v1126_v4, %v665_v19 }
 0x3a6   :  { %v668_v48 = vsel %vm667_vm11, %v1126_v4, %v666_v32 }
 0x3b6   :  { %842 = vrot.lane.b32.xlu0 %v563_v23, %s1138_s6 }
 0x3ba   :  { %840 = vrot.lane.b32.xlu2 %v561_v22, %s1138_s6 }
 0x3be   :  { %846 = vrot.lane.b32.xlu0 %v568_v27, %s1138_s6 }
 0x3c2   :  { %848 = vrot.lane.b32.xlu2 %v571_v29, %s1138_s6 }
 0x3c6   :  { %1060 = vrot.lane.b32.xlu0 %v1139_v0, %s1140_s7 }
 0x3ca   :  { %1065 = vrot.lane.b32.xlu2 %v1139_v0, %s1140_s7 }
 0x405   :  { %v758_v2 = vpop.xlane.xlu1 %757 }
 0x406   :  { %1127 = vrsqrt.f32 %v758_v2  ;;  %vm766_vm12 = vcmp.eq.f32.partialorder %v758_v2, inf  ;;  %v769_v49 = vand.u32 2147483648, %v758_v2  ;;  %vm768_vm13 = vcmp.eq.f32.partialorder %v758_v2, 0.0 }
 0x407   :  { %1129 = vrcp.f32 %v1142_v3 }
 0x40c   :  { %v1128_v5 = vpop.eup %1127 }
 0x40d   :  { %v760_v55 = vmul.f32 %v1128_v5, %v758_v2  ;;  %v741_v6 = vpop.xlane.xlu0 %740  ;;  %v1384_v7 = vpop.xlane.xlu2 %736 }
 0x40e   :  { %1131 = vrsqrt.f32 %v741_v6  ;;  %v1130_v9 = vpop.eup %1129  ;;  %vm749_vm14 = vcmp.eq.f32.partialorder %v741_v6, inf  ;;  %v752_v54 = vand.u32 2147483648, %v741_v6  ;;  %vm751_vm1 = vcmp.eq.f32.partialorder %v741_v6, 0.0 }
 0x40f   :  { %v761_v10 = vmul.f32 %v1128_v5, %v760_v55  ;;  %v725_v12 = vmul.f32 1088.0, %v1130_v9  ;;  %vm729_vm15 = vweird.f32 %v1130_v9 }
 0x411   :  { %v762_v56 = vmul.f32 0.5, %v761_v10  ;;  %v726_v22 = vsub.f32 1.0, %v725_v12 }
 0x413   :  { %v763_v13 = vsub.f32 1.5, %v762_v56  ;;  %v727_v37 = vmul.f32 %v1130_v9, %v726_v22 }
 0x414   :  { %v1132_v14 = vpop.eup %1131 }
 0x415   :  { %v764_v15 = vmul.f32 %v1128_v5, %v763_v13  ;;  %v743_v16 = vmul.f32 %v1132_v14, %v741_v6  ;;  %v715_v17 = vpop.xlane.xlu0 %714  ;;  %v654_v18 = vpop.xlane.xlu2 %653  ;;  %v728_v24 = vadd.f32 %v1130_v9, %v727_v37 }
 0x416   :  { %v716_v20 = vrot.slane %v715_v17, 4  ;;  %v655_v21 = vrot.slane %v654_v18, 4 }
 0x417   :  { %v744_v23 = vmul.f32 %v1132_v14, %v743_v16  ;;  %v765_v30 = vmul.f32 %v764_v15, %v758_v2  ;;  %v730_v60 = vsel %vm729_vm15, %v1130_v9, %v728_v24 }
 0x418   :  { %v717_v27 = vadd.f32 %v716_v20, %v715_v17  ;;  %v656_v29 = vadd.f32 %v655_v21, %v654_v18 }
 0x419   :  { %v745_v31 = vmul.f32 0.5, %v744_v23  ;;  %v767_v45 = vsel %vm766_vm12, %v758_v2, %v765_v30 }
 0x41a   :  { %v718_v33 = vrot.slane %v717_v27, 2  ;;  %v657_v36 = vrot.slane %v656_v29, 2  ;;  %v770_v53 = vsel %vm768_vm13, %v769_v49, %v767_v45 }
 0x41b   :  { %v746_v39 = vsub.f32 1.5, %v745_v31  ;;  %v771_v61 = vmax.f32 %v770_v53, 1e-08 }
 0x41c   :  { %v658_v40 = vadd.f32 %v657_v36, %v656_v29  ;;  %v719_v42 = vadd.f32 %v718_v33, %v717_v27  ;;  %v1143_v27 = vmov 2.0  }
 0x41d   :  { %v747_v46 = vmul.f32 %v1132_v14, %v746_v39  ;;  %v1386_v47 = vpop.permute.xlu2 %840 }
 0x41e   :  { %v659_v50 = vrot.slane %v658_v40, 1  ;;  %v720_v52 = vrot.slane %v719_v42, 1  ;;  %v875_v24 = vsel %vm418_vm4, %v1291_v34, %v1386_v47 }
 0x41f   :  { %v748_v28 = vmul.f32 %v747_v46, %v741_v6 }
 0x420   :  { %v660_v57 = vadd.f32 %v659_v50, %v658_v40  ;;  %v721_v58 = vadd.f32 %v720_v52, %v719_v42  ;;  %v813_v50 = vshrl.u32 %v671_v38, 7 }
 0x421   :  { %v750_v59 = vsel %vm749_vm14, %v741_v6, %v748_v28 }
 0x422   :  { %v753_v26 = vsel %vm751_vm1, %v752_v54, %v750_v59  ;;  %1040 = vpush %v660_v57  ;;  %vm818_vm0 = vcmp.eq.s32.totalorder %v813_v50, 0 }
 0x423   :  { %v754_v62 = vmax.f32 %v753_v26, 1e-08  ;;  %1042 = vpush %v668_v48  ;;  %vm824_vm11 = vmand %vm818_vm0, %vm823_vm10 }
 0x424   :  { %1044 = vpush %v721_v58 }
 0x425   :  { %v772_v63 = vmul.f32 %v771_v61, %v754_v62  ;;  %1046 = vpush %v730_v60  ;;  %v849_v0 = vpop.permute.xlu2 %848 }
 0x426   :  { %v879_v6 = vsel %vm418_vm4, %v1311_v51, %v849_v0 }
 0x427   :  { %1133 = vrcp.f32 %v772_v63  ;;  %v784_v56 = vand.u32 2147483648, %v772_v63  ;;  %v782_v13 = vand.u32 2147483647, %v772_v63  ;;  %vm778_vm3 = vweird.f32 %v772_v63 }
 0x428   :  { %v843_v1 = vpop.permute.xlu0 %842  ;;  %1135 = vrcp.f32 %v1143_v27 }
 0x429   :  { %v785_v15 = vor.u32 1.1754944e-38, %v784_v56  ;;  %vm783_vm7 = vcmp.eq.f32.partialorder %v782_v13, 8.507059e+37  ;;  %v876_v21 = vsel %vm418_vm4, %v1293_v35, %v843_v1 }
 0x42d   :  { %v1134_v2 = vpop.eup %1133  ;;  %v1066_v3 = vpop.permute.xlu2 %1065 }
 0x42e   :  { %v774_v4 = vmul.f32 %v1134_v2, %v772_v63  ;;  %v1068_v5 = vunpack.i.h.bf16 %v1066_v3  ;;  %v1067_v55 = vunpack.i.l.bf16 %v1066_v3  ;;  %vm779_vm2 = vweird.f32 %v1134_v2 }
 0x42f   :  { %vm780_vm5 = vmor %vm778_vm3, %vm779_vm2 }
 0x430   :  { %v775_v8 = vsub.f32 1.0, %v774_v4  ;;  %v884_v9 = vsel %vm475_vm6, %v879_v6, %v1068_v5  ;;  %v847_v10 = vpop.permute.xlu0 %846 }
 0x431   :  { %889 = vst [vmem:[%s1433_s8 + $0x20] sm:$0x3] %v884_v9  ;;  %v878_v11 = vsel %vm418_vm4, %v1300_v44, %v847_v10 }
 0x432   :  { %v776_v12 = vmul.f32 %v1134_v2, %v775_v8  ;;  %v883_v14 = vsel %vm475_vm6, %v878_v11, %v1067_v55 }
 0x433   :  { %888 = vst [vmem:[%s1433_s8 + $0x18] sm:$0xff] %v883_v14 }
 0x434   :  { %v777_v51 = vadd.f32 %v1134_v2, %v776_v12 }
 0x436   :  { %v781_v16 = vsel %vm780_vm5, %v1134_v2, %v777_v51 }
 0x437   :  { %v786_v17 = vsel %vm783_vm7, %v785_v15, %v781_v16 }
 0x438   :  { %v787_v18 = vmul.f32 %v786_v17, %v1384_v7  ;;  %v1061_v19 = vpop.permute.xlu0 %1060  ;;  %v1136_v7 = vpop.eup %1135 }
 0x439   :  { %v1062_v44 = vunpack.i.l.bf16 %v1061_v19  ;;  %v801_v29 = vmul.f32 2.0, %v1136_v7  ;;  %vm805_vm9 = vweird.f32 %v1136_v7  ;;  %v1063_v46 = vunpack.i.h.bf16 %v1061_v19 }
 0x43a   :  { %v788_v20 = vsub.f32 1.0, %v787_v18 }
 0x43b   :  { %v881_v22 = vsel %vm475_vm6, %v876_v21, %v1062_v44  ;;  %v802_v30 = vsub.f32 1.0, %v801_v29 }
 0x43c   :  { %886 = vst [vmem:[%s1433_s8 + $0x8] sm:$0xff] %v881_v22  ;;  %v790_v23 = vsel %vm789_vm8, %v788_v20, 0.0 }
 0x43d   :  { %791 = vadd.xlane.f32.xlu1 %v790_v23  ;;  %v803_v35 = vmul.f32 %v1136_v7, %v802_v30 }
 0x43f   :  { %v804_v39 = vadd.f32 %v1136_v7, %v803_v35 }
 0x441   :  { %v806_v45 = vsel %vm805_vm9, %v1136_v7, %v804_v39 }
 0x453   :  { %s1041_s2 = spop %1040 }
 0x454   :  { %s1043_s16 = spop %1042 }
 0x455   :  { %s1045_s4 = spop %1044  ;;  %s670_s17 = smul.f32 %s1043_s16, %s1041_s2 }
 0x456   :  { %844 = vrot.lane.b32.xlu1 %v1363_v25, %s1138_s6  ;;  %s723_s18 = smul.f32 0.5, %s1045_s4  ;;  %s1047_s1 = spop %1046 }
 0x457   :  { %s809_s5 = smul.f32 10.0, %s670_s17 }
 0x458   :  { %s732_s19 = smul.f32 %s1047_s1, %s723_s18 }
 0x45a   :  { %s810_s22 = sadd.f32 %s809_s5, %s732_s19 }
 0x4b0   :  { %v792_v31 = vpop.xlane.xlu1 %791 }
 0x4b1   :  { %v793_v32 = vrot.slane %v792_v31, 4 }
 0x4b3   :  { %v794_v33 = vadd.f32 %v793_v32, %v792_v31 }
 0x4b5   :  { %v795_v36 = vrot.slane %v794_v33, 2 }
 0x4b7   :  { %v796_v37 = vadd.f32 %v795_v36, %v794_v33 }
 0x4b9   :  { %v797_v40 = vrot.slane %v796_v37, 1 }
 0x4bb   :  { %v798_v42 = vadd.f32 %v797_v40, %v796_v37 }
 0x4bd   :  { %1048 = vpush %v798_v42 }
 0x4be   :  { %1050 = vpush %v806_v45 }
 0x4c8   :  { %v845_v25 = vpop.permute.xlu1 %844 }
 0x4c9   :  { %v877_v48 = vsel %vm418_vm4, %v1298_v43, %v845_v25 }
 0x4ca   :  { %v882_v49 = vsel %vm475_vm6, %v877_v48, %v1063_v46 }
 0x4cb   :  { %887 = vst [vmem:[%s1433_s8 + $0x10] sm:$0xff] %v882_v49 }
 0x4ee   :  { %s1049_s20 = spop %1048 }
 0x4ef   :  { %s1051_s21 = spop %1050 }
 0x4f0   :  { %s808_s0 = smul.f32 %s1051_s21, %s1049_s20 }
 0x4f2   :  { %s811_s23 = sadd.f32 %s810_s22, %s808_s0 }
 0x4f4   :  { %v829_v43 = vstv %s811_s23 }
 0x4f5   :  { %v830_v52 = vsel %vm824_vm11, %v829_v43, 0.0 }
 0x4f6   :  { %860 = vrot.lane.b32.xlu1 %v830_v52, %s1140_s7 }
 0x568   :  { %v861_v28 = vpop.permute.xlu1 %860 }
 0x569   :  { %v880_v38 = vsel %vm475_vm6, %v875_v24, %v861_v28 }
 0x56a   :  { %885 = vst [vmem:[%s1433_s8] sm:$0xff] %v880_v38 }

</bundles_post_ra>
